<compile_context>
chip_gen: v5e
topology: v5e:2x2
jax: 0.10.0
libtpu: 0.0.40
codegen_flags: <defaults>
</compile_context>

<pallas_src>
import functools

import jax
import jax.numpy as jnp
from jax.experimental import pallas as pl
from jax.experimental.pallas import tpu as pltpu


def _round_up(x, m):
    return ((x + m - 1) // m) * m


def _mhn_kernel(x_ref, w_in_ref, b_in_ref, w_out_ref, b_out_ref, o_ref):
    # First per-head Linear, all heads fused into one MXU dot.
    # bf16 operands, f32 accumulation.
    x = x_ref[...].astype(w_in_ref.dtype)                               # (TN, D_in)
    h = jnp.dot(x, w_in_ref[...],
                preferred_element_type=jnp.float32) + b_in_ref[...]     # (TN, H*D_hid)
    # LeakyReLU, PyTorch default negative_slope = 0.01
    h = jnp.where(h >= 0, h, 0.01 * h)
    # Second per-head Linear via block-diagonal weight (exact: zero blocks
    # kill all cross-head terms).
    o = jnp.dot(h.astype(w_out_ref.dtype), w_out_ref[...],
                preferred_element_type=jnp.float32) + b_out_ref[...]    # (TN, H*D_out)
    o_ref[...] = o.astype(o_ref.dtype)


def pack_mhn_params(w_in, b_in, w_out, b_out, compute_dtype=jnp.bfloat16):
    """One-time parameter packing. Call at model init, NOT per forward.

    w_in  : (H, D_in,  D_hid)   b_in  : (H, 1, D_hid)
    w_out : (H, D_hid, D_out)   b_out : (H, 1, D_out)
    Returns (w_in_cat, b_in_cat, w_out_bd, b_out_cat):
      w_in_cat  (D_in, H*D_hid)   head-major columns, compute_dtype
      b_in_cat  (1, H*D_hid)      f32
      w_out_bd  (H*D_hid, H*D_out) block-diagonal, compute_dtype
      b_out_cat (1, H*D_out)      f32
    """
    H, d_in, d_hid = w_in.shape
    d_out = w_out.shape[-1]
    w_in_cat = jnp.transpose(w_in, (1, 0, 2)).reshape(d_in, H * d_hid)
    w_in_cat = w_in_cat.astype(compute_dtype)
    b_in_cat = b_in.reshape(1, H * d_hid).astype(jnp.float32)
    w_out_bd = jax.scipy.linalg.block_diag(*[w_out[h] for h in range(H)])
    w_out_bd = w_out_bd.astype(compute_dtype)
    b_out_cat = b_out.reshape(1, H * d_out).astype(jnp.float32)
    return w_in_cat, b_in_cat, w_out_bd, b_out_cat


@functools.partial(jax.jit, static_argnames=("tile_n", "out_dtype"))
def _mhn_forward_flat(x, w_in_cat, b_in_cat, w_out_bd, b_out_cat, *,
                      tile_n, out_dtype):
    N, d_in = x.shape
    hd_hid = w_in_cat.shape[1]
    hd_out = w_out_bd.shape[1]

    # Row-tile: multiple of 8; large to amortize per-step overhead; capped at
    # ceil(N/2) (rounded up to 8) so the parallel grid axis has >= 2 steps
    # (keeps both v7x TensorCores busy; negligible on single-TC v5e/v6e).
    tn = min(_round_up(max(tile_n, 8), 8),
             max(8, _round_up(pl.cdiv(N, 2), 8)))
    grid = (pl.cdiv(N, tn),)   # ragged last tile handled by Pallas masking

    return pl.pallas_call(
        _mhn_kernel,
        out_shape=jax.ShapeDtypeStruct((N, hd_out), out_dtype),
        grid_spec=pltpu.PrefetchScalarGridSpec(
            num_scalar_prefetch=0,
            grid=grid,
            in_specs=[
                pl.BlockSpec((tn, d_in), lambda i: (i, 0)),         # x row tile
                pl.BlockSpec((d_in, hd_hid), lambda i: (0, 0)),     # fused W_in (resident)
                pl.BlockSpec((1, hd_hid), lambda i: (0, 0)),        # fused b_in
                pl.BlockSpec((hd_hid, hd_out), lambda i: (0, 0)),   # block-diag W_out
                pl.BlockSpec((1, hd_out), lambda i: (0, 0)),        # fused b_out
            ],
            out_specs=pl.BlockSpec((tn, hd_out), lambda i: (i, 0)),  # lane-dense slab
        ),
        compiler_params=pltpu.CompilerParams(
            dimension_semantics=("parallel",),
            vmem_limit_bytes=48 * 1024 * 1024,
        ),
    )(x, w_in_cat, b_in_cat, w_out_bd, b_out_cat)


def multi_head_network(fea, packed_params, *, nb_heads, tile_n=2048,
                       out_dtype=None):
    """Forward pass. `packed_params` from pack_mhn_params (packed ONCE).
    fea: (..., D_in) -> output (-1, nb_heads, D_out)."""
    w_in_cat, b_in_cat, w_out_bd, b_out_cat = packed_params
    d_in = w_in_cat.shape[0]
    d_out = w_out_bd.shape[1] // nb_heads
    x = fea.reshape(-1, d_in)                 # matches fea.view(-1, D_in, 1)
    out_dtype = x.dtype if out_dtype is None else out_dtype
    out_flat = _mhn_forward_flat(x, w_in_cat, b_in_cat, w_out_bd, b_out_cat,
                                 tile_n=tile_n, out_dtype=out_dtype)
    # (N, H*D_out) -> (N, H, D_out): free contiguous view == .view(-1, H, D_out)
    return out_flat.reshape(-1, nb_heads, d_out)


def reference(x, w_in, b_in, w_out, b_out):
    # Pure-JAX f32 reference of the grouped-Conv1d(k=1) forward.
    h = jnp.einsum("nd,hdk->hnk", x, w_in) + b_in          # (H, N, D_hid)
    h = jnp.where(h >= 0, h, 0.01 * h)
    o = jnp.einsum("hnk,hko->hno", h, w_out) + b_out       # (H, N, D_out)
    return jnp.transpose(o, (1, 0, 2))                     # (N, H, D_out)


if __name__ == "__main__":
    # Small shapes consistent with the module
    N = 32            # number of (flattened) feature rows
    D_IN = 16         # input_dim
    D_HID = 32        # hidden_layer_dim
    D_OUT = 8         # output_dim
    H = 4             # nb_heads

    key = jax.random.PRNGKey(0)
    k_x, k_wi, k_bi, k_wo, k_bo = jax.random.split(key, 5)

    fea = jax.random.normal(k_x, (N, D_IN), dtype=jnp.float32)

    # Per-head parameters of Conv1d(k=1, groups=H): per head (D_in -> D_hid),
    # stored transposed so the kernel computes x @ W.
    w_in = jax.random.normal(k_wi, (H, D_IN, D_HID), dtype=jnp.float32) * 0.1
    b_in = jax.random.normal(k_bi, (H, 1, D_HID), dtype=jnp.float32) * 0.1
    w_out = jax.random.normal(k_wo, (H, D_HID, D_OUT), dtype=jnp.float32) * 0.1
    b_out = jax.random.normal(k_bo, (H, 1, D_OUT), dtype=jnp.float32) * 0.1

    # Pack once at "model init" (hoisted out of the per-call path).
    packed = pack_mhn_params(w_in, b_in, w_out, b_out, compute_dtype=jnp.bfloat16)

    out = multi_head_network(fea, packed, nb_heads=H)
    out = jax.block_until_ready(out)

    ref = reference(fea, w_in, b_in, w_out, b_out)
    assert out.shape == (N, H, D_OUT), out.shape
    # bf16 MXU operands (f32 accumulation) -> loose-ish tolerance vs f32 ref.
    max_err = float(jnp.max(jnp.abs(out.astype(jnp.float32) - ref)))
    assert jnp.allclose(out.astype(jnp.float32), ref, atol=3e-2, rtol=3e-2), max_err

    print("KERNEL_OK")
</pallas_src>

<mosaic_0001>
module attributes {stable_mosaic.version = 11 : i64} {
  func.func @_mhn_kernel(%arg0: i32, %arg1: memref<16x16xf32, #tpu.memory_space<vmem>>, %arg2: memref<16x128xbf16, #tpu.memory_space<vmem>>, %arg3: memref<1x128xf32, #tpu.memory_space<vmem>>, %arg4: memref<128x32xbf16, #tpu.memory_space<vmem>>, %arg5: memref<1x32xf32, #tpu.memory_space<vmem>>, %arg6: memref<16x32xf32, #tpu.memory_space<vmem>>) attributes {dimension_semantics = [#tpu.dimension_semantics<parallel>], iteration_bounds = array<i64: 2>, scalar_prefetch = 0 : i64, scratch_operands = 0 : i64, tpu.core_type = #tpu.core_type<tc>, window_params = [{transform_indices = @transform_0, window_bounds = array<i64: 16, 16>}, {pipeline_mode = #tpu.pipeline_mode<synchronous>, transform_indices = @transform_1, window_bounds = array<i64: 16, 128>}, {pipeline_mode = #tpu.pipeline_mode<synchronous>, transform_indices = @transform_2, window_bounds = array<i64: 1, 128>}, {pipeline_mode = #tpu.pipeline_mode<synchronous>, transform_indices = @transform_3, window_bounds = array<i64: 128, 32>}, {pipeline_mode = #tpu.pipeline_mode<synchronous>, transform_indices = @transform_4, window_bounds = array<i64: 1, 32>}, {transform_indices = @transform_5, window_bounds = array<i64: 16, 32>}]} {
    %c0 = arith.constant 0 : index
    %c0_0 = arith.constant 0 : index
    %0 = vector.load %arg1[%c0, %c0_0] : memref<16x16xf32, #tpu.memory_space<vmem>>, vector<16x16xf32>
    %1 = arith.truncf %0 : vector<16x16xf32> to vector<16x16xbf16>
    %c0_1 = arith.constant 0 : index
    %c0_2 = arith.constant 0 : index
    %2 = vector.load %arg2[%c0_1, %c0_2] : memref<16x128xbf16, #tpu.memory_space<vmem>>, vector<16x128xbf16>
    %cst = arith.constant dense<0.000000e+00> : vector<16x128xf32>
    %3 = tpu.matmul %1, %2, %cst {dimension_numbers = #tpu.dot_dimension_numbers<[1], [0], [0], [1], [0, 0, 1, 1], [], []>} : vector<16x16xbf16>, vector<16x128xbf16>, vector<16x128xf32> -> vector<16x128xf32>
    %c0_3 = arith.constant 0 : index
    %c0_4 = arith.constant 0 : index
    %4 = vector.load %arg3[%c0_3, %c0_4] : memref<1x128xf32, #tpu.memory_space<vmem>>, vector<1x128xf32>
    %5 = vector.broadcast %4 : vector<1x128xf32> to vector<16x128xf32>
    %6 = arith.addf %3, %5 : vector<16x128xf32>
    %cst_5 = arith.constant 0.000000e+00 : f32
    %7 = vector.broadcast %cst_5 : f32 to vector<16x128xf32>
    %8 = arith.cmpf oge, %6, %7 : vector<16x128xf32>
    %cst_6 = arith.constant 0.00999999977 : f32
    %9 = vector.broadcast %cst_6 : f32 to vector<16x128xf32>
    %10 = arith.mulf %9, %6 : vector<16x128xf32>
    %11 = arith.select %8, %6, %10 : vector<16x128xi1>, vector<16x128xf32>
    %12 = arith.truncf %11 : vector<16x128xf32> to vector<16x128xbf16>
    %c0_7 = arith.constant 0 : index
    %c0_8 = arith.constant 0 : index
    %13 = vector.load %arg4[%c0_7, %c0_8] : memref<128x32xbf16, #tpu.memory_space<vmem>>, vector<128x32xbf16>
    %cst_9 = arith.constant dense<0.000000e+00> : vector<16x32xf32>
    %14 = tpu.matmul %12, %13, %cst_9 {dimension_numbers = #tpu.dot_dimension_numbers<[1], [0], [0], [1], [0, 0, 1, 1], [], []>} : vector<16x128xbf16>, vector<128x32xbf16>, vector<16x32xf32> -> vector<16x32xf32>
    %c0_10 = arith.constant 0 : index
    %c0_11 = arith.constant 0 : index
    %15 = vector.load %arg5[%c0_10, %c0_11] : memref<1x32xf32, #tpu.memory_space<vmem>>, vector<1x32xf32>
    %16 = vector.broadcast %15 : vector<1x32xf32> to vector<16x32xf32>
    %17 = arith.addf %14, %16 : vector<16x32xf32>
    %c0_12 = arith.constant 0 : index
    %c0_13 = arith.constant 0 : index
    %18 = vector.load %arg6[%c0_12, %c0_13] : memref<16x32xf32, #tpu.memory_space<vmem>>, vector<16x32xf32>
    tpu.vector_store %arg6[%c0_12, %c0_13], %17 {strides = array<i32>} : memref<16x32xf32, #tpu.memory_space<vmem>>, vector<16x32xf32>,
    return
  }
  func.func @transform_0(%arg0: i32) -> (i32, i32) {
    %c0_i32 = arith.constant 0 : i32
    %c0_i32_0 = arith.constant 0 : i32
    return %arg0, %c0_i32 : i32, i32
  }
  func.func @transform_1(%arg0: i32) -> (i32, i32) {
    %c0_i32 = arith.constant 0 : i32
    %c0_i32_0 = arith.constant 0 : i32
    %c0_i32_1 = arith.constant 0 : i32
    return %c0_i32, %c0_i32_0 : i32, i32
  }
  func.func @transform_2(%arg0: i32) -> (i32, i32) {
    %c0_i32 = arith.constant 0 : i32
    %c0_i32_0 = arith.constant 0 : i32
    %c0_i32_1 = arith.constant 0 : i32
    return %c0_i32, %c0_i32_0 : i32, i32
  }
  func.func @transform_3(%arg0: i32) -> (i32, i32) {
    %c0_i32 = arith.constant 0 : i32
    %c0_i32_0 = arith.constant 0 : i32
    %c0_i32_1 = arith.constant 0 : i32
    return %c0_i32, %c0_i32_0 : i32, i32
  }
  func.func @transform_4(%arg0: i32) -> (i32, i32) {
    %c0_i32 = arith.constant 0 : i32
    %c0_i32_0 = arith.constant 0 : i32
    %c0_i32_1 = arith.constant 0 : i32
    return %c0_i32, %c0_i32_0 : i32, i32
  }
  func.func @transform_5(%arg0: i32) -> (i32, i32) {
    %c0_i32 = arith.constant 0 : i32
    %c0_i32_0 = arith.constant 0 : i32
    return %arg0, %c0_i32 : i32, i32
  }
}

</mosaic_0001>

<bundles_post_ra>
// kernel: _mhn_forward_flat.1
= control target key start
LH: loop header
LB: loop body
LE: loop exit
PB: predicated region body
PF: predicated region fallthrough
CT: control target
= control target key end

     0   :  { %10 = vsyncpa [#allocation3], 0  ;;  %s745_s0 = inlined_call_operand.vmem [shape: f32[32,16], index: 0, kind: input, shape index: {}]   ;;  %s746_s1 = inlined_call_operand.vmem [shape: bf16[16,128], index: 1, kind: input, shape index: {}]   ;;  %s747_s2 = inlined_call_operand.vmem [shape: f32[1,128], index: 2, kind: input, shape index: {}]   ;;  %s748_s3 = inlined_call_operand.vmem [shape: bf16[128,32], index: 3, kind: input, shape index: {}]   ;;  %s749_s4 = inlined_call_operand.vmem [shape: f32[1,32], index: 4, kind: input, shape index: {}]   ;;  %s750_s5 = inlined_call_operand.hbm [shape: f32[32,32], index: 5, kind: output, shape index: {}]  }
   0x1   :  { %12 = vsyncpa [#allocation3 + $0x1], 0  ;;  %s628_s18 = smov 0   ;;  %s630_s19 = smov 0  }
   0x2   :  { %s632_s20 = smov 0   ;;  %s634_s21 = smov 0  }
   0x3 LB: > { %s649_s22 = sadd.s32 4294967295, %s594_s21   ;;  %s430_s23 = sadd.s32 4294967294, %s594_s21   ;;  %s594_s21 = sphi %s634_s21, %s756_s21   ;;  %s590_s20 = sphi %s632_s20, %s755_s20   ;;  %s586_s19 = sphi %s630_s19, %s754_s19   ;;  %s582_s18 = sphi %s628_s18, %s753_s18  }
   0x4   : > { %s653_s24 = sadd.s32 1, %s594_s21   ;;  %s135_s25 = sadd.s32 1, %s590_s20 }
   0x5   : > { %s132_s26 = ssub.s32 %s594_s21, %s653_s24  ;;  %p145_p0 = scmp.ne.s32.totalorder %s590_s20, %s586_s19 }
   0x6   : > { %p133_p1 = scmp.eq.s32.totalorder %s132_s26, 0  ;;  %p146_p2 = scmp.eq.s32.totalorder %s649_s22, 1 }
   0x7   : > { %p151_p3 = scmp.ne.s32.totalorder %s586_s19, %s582_s18  ;;  %p152_p4 = scmp.eq.s32.totalorder %s430_s23, 1 }
   0x8   : > { %s664_s27 = scalar_select %p133_p1, %s590_s20, %s135_s25  }
   0x9   : > { %p666_p5 = por %p146_p2, %p145_p0  ;;  %p670_p6 = por %p152_p4, %p151_p3 }
   0xa   : > { %p433_p7 = scmp.ge.s32.totalorder %s594_s21, 1  ;;  %p191_p8 = scmp.lt.s32.totalorder %s594_s21, 3 }
   0xc   : > { %p192_p9 = pnand %p433_p7, %p191_p8 }
   0xd   : > { %s435_s7 = sshll.u32 (!%p192_p9), %s649_s22, 1  ;;  %s216_s14 = sand.u32 (!%p192_p9), 1, %s586_s19  }
   0xe   : > { %195 = sbr.rel (%p192_p9) target bundleno = 306 (0x132), region = 40  ;;  %p220_p10 = scmp.lt.s32.totalorder (!%p192_p9), %s435_s7, 3 }
   0xf   : > { %s488_s23 = sshll.u32 (!%p192_p9), %s649_s22, 4  ;;  %s353_s9 = scalar_lea.sflag (!%p192_p9), [#allocation3], %s216_s14 }
  0x10   : > { %s364_s30 = scalar_lea.hbm (!%p192_p9), %s750_s5, %s488_s23  ;;  %s552_s13 = scalar_lea.hbm (!%p192_p9), %s750_s5, 32 }
  0x11   : > { %s367_s8 = sshll.u32 (!%p192_p9), %s364_s30, 4  ;;  %s368_s8 = int_to_ptr.hbm [resolvable:$true] %s367_s8 }
  0x12   : > { %s546_s10 = sshra.s32 (!%p192_p9), %s368_s8, 4  ;;  %s547_s10 = int_to_ptr.hbm [resolvable:$true] %s546_s10 }
  0x13   : > { %v479_v0 = vld [vmem:[%s746_s1] sm:$0xff]  ;;  %v487_v1 = vld [vmem:[%s748_s3 + $0x38] sm:$0xff]  ;;  %v486_v2 = vld [vmem:[%s748_s3 + $0x30] sm:$0xff]  ;;  %s758_s7 = smov (!%p220_p10, %s435_s7), 3  ;;  %vm242_vm0 = vcmask 130048   ;;  %vm349_vm3 = vcmask 261120   ;;  %p553_p0 = scmp.lt.s32.totalorder %s547_s10, %s750_s5 }
  0x14   : > { %253 = vmatpush.bf16.msra.mxu0 %v479_v0  ;;  %335 = vmatpush.bf16.msra.mxu1 %v487_v1  ;;  %s436_s12 = sshll.u32 %s758_s7, 3  ;;  %v485_v3 = vld [vmem:[%s748_s3 + $0x28] sm:$0xff]  ;;  %v484_v7 = vld [vmem:[%s748_s3 + $0x20] sm:$0xff]  ;;  %v483_v8 = vld [vmem:[%s748_s3 + $0x18] sm:$0xff]  ;;  %s548_s22 = scalar_lea.hbm %s547_s10, 16 }
  0x15   : > { %s223_s15 = scalar_lea.vmem %s745_s0, %s436_s12  ;;  %v482_v9 = vld [vmem:[%s748_s3 + $0x10] sm:$0xff]  ;;  %v481_v10 = vld [vmem:[%s748_s3 + $0x8] sm:$0xff]  ;;  %v480_v11 = vld [vmem:[%s748_s3] sm:$0xff]  ;;  %p549_p11 = scmp.ne.s32.totalorder %s547_s10, %s548_s22 }
  0x16   : > { %v227_v4 = vld [vmem:[%s223_s15] sm:$0xff]  ;;  %v228_v5 = vld [vmem:[%s223_s15 + $0x8] sm:$0xff]  ;;  %s434_s15 = sshll.u32 %s216_s14, 4  ;;  %p554_p1 = scmp.lt.s32.totalorder %s552_s13, %s548_s22 }
  0x17   : > { %v229_v6 = vpack.c.bf16 %v228_v5, %v227_v4  ;;  %v530_v13 = vld [vmem:[%s747_s2] ss:$0 sm:$0xff]  ;;  %s218_s6 = scalar_lea.vmem [#allocation2], %s434_s15  ;;  %p550_p12 = pnand %p549_p11, %p666_p5 }
  0x18   : > { %336 = vmatpush.bf16.msra.mxu1 %v486_v2  ;;  %v531_v22 = vld [vmem:[%s749_s4] ss:$0 sm:$0xff]  ;;  %s365_s7 = sshll.u32 %s218_s6, 4  ;;  %p555_p2 = por %p554_p1, %p553_p0  ;;  %s366_s7 = int_to_ptr.vmem [resolvable:$true] %s365_s7 }
  0x19   : > { %441 = vmatmul.msk.bf16.vlgmr.msra.gmra.mxu0 %vm242_vm0, %v229_v6  ;;  %p551_p13 = pneg %p550_p12 }
  0x1b   : > { %p556_p3 = pnand %p555_p2, %p551_p13 }
  0x1c   : > { %337 = vmatpush.bf16.msra.mxu1 %v485_v3 }
  0x20   : > { %338 = vmatpush.bf16.msra.mxu1 %v484_v7 }
  0x24   : > { %339 = vmatpush.bf16.msra.mxu1 %v483_v8 }
  0x28   : > { %340 = vmatpush.bf16.msra.mxu1 %v482_v9 }
  0x2c   : > { %341 = vmatpush.bf16.msra.mxu1 %v481_v10 }
  0x30   : > { %342 = vmatpush.bf16.msra.mxu1 %v480_v11 }
  0x96   : > { %v255_v12 = vpop.f32.mrf.mxu0 }
  0x97   : > { %v256_v14 = vadd.f32 %v530_v13, %v255_v12 }
  0x99   : > { %v262_v16 = vmul.f32 0.01, %v256_v14  ;;  %vm260_vm1 = vcmp.ge.f32.partialorder %v256_v14, 0.0 }
  0x9b   : > { %v264_v19 = vsel %vm260_vm1, %v256_v14, %v262_v16 }
  0x9e   : > { %v257_v15 = vpop.f32.mrf.mxu0 }
  0x9f   : > { %v258_v17 = vadd.f32 %v530_v13, %v257_v15 }
  0xa1   : > { %v263_v18 = vmul.f32 0.01, %v258_v17  ;;  %vm261_vm2 = vcmp.ge.f32.partialorder %v258_v17, 0.0 }
  0xa3   : > { %v265_v20 = vsel %vm261_vm2, %v258_v17, %v263_v18 }
  0xa4   : > { %v266_v21 = vpack.c.bf16 %v265_v20, %v264_v19 }
  0xa6   : > { %343 = vmatmul.bf16.vlgmr.msra.gmra.mxu1 %v266_v21 }
 0x123   : > { %v344_v23 = vpop.f32.mrf.mxu1 }
 0x124   : > { %v345_v24 = vadd.f32 %v531_v22, %v344_v23 }
 0x126   : > { %350 = vst.msk [vmem:[%s218_s6] sm:$0xff] %vm349_vm3, %v345_v24 }
 0x12b   : > { %v346_v25 = vpop.f32.mrf.mxu1 }
 0x12c   : > { %v347_v26 = vadd.f32 %v531_v22, %v346_v25 }
 0x12e   : > { %351 = vst.msk [vmem:[%s218_s6 + $0x8] sm:$0xff] %vm349_vm3, %v347_v26 }
 0x12f   : > { %559 = shalt.err (!%p556_p3)
}
 0x130   : > { %s596_s14 = smov 128   ;;  %s597_s17 = smov 8  }
 0x131   : > { %489 = dma.vmem_to_hbm [thread:$0]  (%p666_p5), %s366_s7, 256, %s368_s8, %s353_s9, %s596_s14, %s596_s14, %s597_s17  }
 0x132 PF: > { %p495_p4 = scmp.ge.s32.totalorder %s594_s21, 2  ;;  %s382_s23 = sand.u32 1, %s582_s18  }
 0x133   : > { %s383_s25 = scalar_lea.sflag [#allocation3], %s382_s23 }
 0x134   : > { %p492_p7 = pnand %p495_p4, %p670_p6 }
 0x136   : > { %p493_p8 = pneg %p492_p7 }
 0x138   : > { %577 = dma.done.wait (%p493_p8), %s383_s25, 256  }
 0x139   : > { %579 = vsyncadd (%p493_p8), %s383_s25, 4294967040  ;;  %p15_p9 = scmp.ge.s32.totalorder %s653_s24, 4   ;;  %s753_s18 = smov %s586_s19 }
 0x13a   : > { %s754_s19 = smov %s590_s20  ;;  %s755_s20 = smov %s664_s27 }
 0x13b   : > { %s756_s21 = smov %s653_s24  ;;  %17 = sbr.rel (!%p15_p9) target bundleno = 3 (0x3), region = 75 }
 0x140   :  { %389 = vsyncpa [#allocation3], 1 }
 0x141   :  { %391 = vsyncpa [#allocation3 + $0x1], 1 }

</bundles_post_ra>
